<compile_context>
chip_gen: v5e
topology: v5e:2x2
jax: 0.10.0
libtpu: 0.0.40
codegen_flags: <defaults>
</compile_context>

<pallas_src>
import jax
import jax.numpy as jnp
import numpy as np
from jax.experimental import pallas as pl
from jax.experimental.pallas import tpu as pltpu

_LANE = 128
_SUBLANE = 8
# Per-step streamed VMEM budget (tgt + out blocks, double-buffered).  Fits the
# 32 MiB scoped limit we request and leaves ample headroom on v7x (64 MiB
# physical) as well as v5e/v6e (128 MiB).
_VMEM_STREAM_BUDGET = 20 << 20


def _round_up(x, m):
    return (x + m - 1) // m * m


def value_model_kernel(vm_ref, tgt_ref, out_ref):
    # vm_ref : (tb, 1, C)   per-batch-row coefficient vector (tiny, resident)
    # tgt_ref: (tb, tl, C)  streamed candidate features, native layout
    # out_ref: (tb, tl, 1)  pointwise scores
    # out[b, l] = sum_c tgt[b, l, c] * vm[b, c]
    out_ref[...] = jnp.sum(tgt_ref[...] * vm_ref[...], axis=2, keepdims=True)


def value_model_forward(state_features, tgt_out_seq, weight, bias):
    B, S = state_features.shape
    Bt, L, C = tgt_out_seq.shape
    assert Bt == B
    assert weight.shape == (C, S)
    assert bias.shape == (C,)

    # Hoisted tiny matmul (2*B*S*C flops): vm_coef = layer1(state_features).
    vm = (state_features @ weight.T + bias).astype(jnp.float32)      # (B, C)
    vm = vm.reshape(B, 1, C)       # broadcast-friendly shape for the kernel

    # ---- tile selection -----------------------------------------------------
    # VMEM cost per streamed row includes the 128-lane padding of the narrow-C
    # input row and the width-1 output row; HBM traffic is only C*4 per row.
    vmem_row_bytes = (_round_up(C, _LANE) + _LANE) * 4
    max_rows = max(
        _SUBLANE,
        (_VMEM_STREAM_BUDGET // (2 * vmem_row_bytes)) // _SUBLANE * _SUBLANE,
    )

    if L <= max_rows:
        # Whole L fits in one block (block dim == full array dim is always
        # layout-legal); block several batch rows per step to reach MB scale.
        tl = L
        tb = max(1, min(B, max_rows // max(L, 1)))
        while B % tb:              # keep the batch grid exact (no ragged B blocks)
            tb -= 1
        n_l = 1
    else:
        # Large L: stream multiple-of-8 row tiles.  The ragged last tile reads
        # past L (undefined values, harmless) and its extra rows land in the
        # padded output buffer, sliced off below -- tgt itself is never padded
        # or copied wrapper-side.
        tl = max_rows
        tb = 1
        n_l = pl.cdiv(L, tl)
    Lp = n_l * tl
    n_b = B // tb

    cost = pl.CostEstimate(
        flops=2 * B * L * C,
        transcendentals=0,
        bytes_accessed=4 * (B * L * C + B * C + B * Lp),
    )

    out = pl.pallas_call(
        value_model_kernel,
        out_shape=jax.ShapeDtypeStruct((B, Lp, 1), jnp.float32),
        grid=(n_b, n_l),
        in_specs=[
            pl.BlockSpec((tb, 1, C), lambda bi, li: (bi, 0, 0)),     # resident coef
            pl.BlockSpec((tb, tl, C), lambda bi, li: (bi, li, 0)),   # streamed tgt
        ],
        out_specs=pl.BlockSpec((tb, tl, 1), lambda bi, li: (bi, li, 0)),
        compiler_params=pltpu.CompilerParams(
            # No carried state -> both axes parallel (v7x megacore sharding).
            dimension_semantics=("parallel", "parallel"),
            vmem_limit_bytes=32 << 20,
        ),
        cost_estimate=cost,
        # NOTE: if the DMA is still exposed at step boundaries on real shapes,
        # sweep pipeline_mode=pl.Buffered(3) on the streamed tgt BlockSpec.
    )(vm, tgt_out_seq)

    # Drop the L padding of the output buffer (the input was never padded).
    # TODO(synk): torch .squeeze() also drops B==1 / L==1 dims; we always
    # return (B, L).
    return out.reshape(B, Lp)[:, :L]


def reference_forward(state_features, tgt_out_seq, weight, bias):
    vm_coef = state_features @ weight.T + bias                 # (B, C)
    return jnp.einsum("blc,bc->bl", tgt_out_seq, vm_coef)      # (B, L)


if __name__ == "__main__":
    # Small shapes consistent with the module's forward.
    B = 2    # batch
    S = 32   # state_feat_dim
    C = 16   # candidate_feat_dim
    L = 8    # candidate sequence length
    # hidden_size is declared in __init__ but unused in forward.

    key = jax.random.PRNGKey(0)
    k_state, k_tgt, k_w, k_b = jax.random.split(key, 4)

    state_features = jax.random.normal(k_state, (B, S), dtype=jnp.float32)
    tgt_out_seq = jax.random.normal(k_tgt, (B, L, C), dtype=jnp.float32)

    # Deterministic parameter init mirroring nn.Linear + xavier_uniform_ on the weight.
    xavier_limit = float(np.sqrt(6.0 / (S + C)))
    weight = jax.random.uniform(k_w, (C, S), minval=-xavier_limit, maxval=xavier_limit,
                                dtype=jnp.float32)
    bias_limit = float(1.0 / np.sqrt(S))
    bias = jax.random.uniform(k_b, (C,), minval=-bias_limit, maxval=bias_limit,
                              dtype=jnp.float32)

    out = value_model_forward(state_features, tgt_out_seq, weight, bias)
    out = jax.block_until_ready(out)

    ref = reference_forward(state_features, tgt_out_seq, weight, bias)
    np.testing.assert_allclose(np.asarray(out), np.asarray(ref), rtol=1e-5, atol=1e-5)

    print("KERNEL_OK")
</pallas_src>

<mosaic_0001>
module attributes {stable_mosaic.version = 11 : i64} {
  func.func @value_model_kernel(%arg0: i32, %arg1: i32, %arg2: memref<2x1x16xf32, #tpu.memory_space<vmem>>, %arg3: memref<2x8x16xf32, #tpu.memory_space<vmem>>, %arg4: memref<2x8x1xf32, #tpu.memory_space<vmem>>) attributes {dimension_semantics = [#tpu.dimension_semantics<parallel>, #tpu.dimension_semantics<parallel>], iteration_bounds = array<i64: 1, 1>, scalar_prefetch = 0 : i64, scratch_operands = 0 : i64, tpu.core_type = #tpu.core_type<tc>, window_params = [{transform_indices = @transform_0, window_bounds = array<i64: 2, 1, 16>}, {transform_indices = @transform_1, window_bounds = array<i64: 2, 8, 16>}, {transform_indices = @transform_2, window_bounds = array<i64: 2, 8, 1>}]} {
    %c0 = arith.constant 0 : index
    %c0_0 = arith.constant 0 : index
    %c0_1 = arith.constant 0 : index
    %0 = vector.load %arg3[%c0, %c0_0, %c0_1] : memref<2x8x16xf32, #tpu.memory_space<vmem>>, vector<2x8x16xf32>
    %c0_2 = arith.constant 0 : index
    %c0_3 = arith.constant 0 : index
    %c0_4 = arith.constant 0 : index
    %1 = vector.load %arg2[%c0_2, %c0_3, %c0_4] : memref<2x1x16xf32, #tpu.memory_space<vmem>>, vector<2x1x16xf32>
    %2 = vector.broadcast %1 : vector<2x1x16xf32> to vector<2x8x16xf32>
    %3 = arith.mulf %0, %2 : vector<2x8x16xf32>
    %cst = arith.constant dense<0.000000e+00> : vector<2x8xf32>
    %4 = vector.multi_reduction <add>, %3, %cst [2] : vector<2x8x16xf32> to vector<2x8xf32>
    %5 = vector.shape_cast %4 : vector<2x8xf32> to vector<2x8x1xf32>
    %c0_5 = arith.constant 0 : index
    %c0_6 = arith.constant 0 : index
    %c0_7 = arith.constant 0 : index
    %6 = vector.load %arg4[%c0_5, %c0_6, %c0_7] : memref<2x8x1xf32, #tpu.memory_space<vmem>>, vector<2x8x1xf32>
    tpu.vector_store %arg4[%c0_5, %c0_6, %c0_7], %5 {strides = array<i32>} : memref<2x8x1xf32, #tpu.memory_space<vmem>>, vector<2x8x1xf32>,
    return
  }
  func.func @transform_0(%arg0: i32, %arg1: i32) -> (i32, i32, i32) {
    %c0_i32 = arith.constant 0 : i32
    %c0_i32_0 = arith.constant 0 : i32
    %c0_i32_1 = arith.constant 0 : i32
    return %arg0, %c0_i32, %c0_i32_0 : i32, i32, i32
  }
  func.func @transform_1(%arg0: i32, %arg1: i32) -> (i32, i32, i32) {
    %c0_i32 = arith.constant 0 : i32
    %c0_i32_0 = arith.constant 0 : i32
    return %arg0, %arg1, %c0_i32 : i32, i32, i32
  }
  func.func @transform_2(%arg0: i32, %arg1: i32) -> (i32, i32, i32) {
    %c0_i32 = arith.constant 0 : i32
    %c0_i32_0 = arith.constant 0 : i32
    return %arg0, %arg1, %c0_i32 : i32, i32, i32
  }
}

</mosaic_0001>

<bundles_post_ra>
// kernel: tpu_custom_call.1
= control target key start
LH: loop header
LB: loop body
LE: loop exit
PB: predicated region body
PF: predicated region fallthrough
CT: control target
= control target key end

     0   :  { %7 = vsyncpa [#allocation3], 0  ;;  %s164_s0 = inlined_call_operand.hbm [shape: f32[2,1,16], index: 0, kind: input, shape index: {}]   ;;  %s165_s1 = inlined_call_operand.hbm [shape: f32[2,8,16], index: 1, kind: input, shape index: {}]   ;;  %s166_s2 = inlined_call_operand.vmem [shape: f32[2,8,1], index: 2, kind: output, shape index: {}]  }
   0x1   :  { %s13_s11 = sshll.u32 %s164_s0, 4  ;;  %s14_s11 = int_to_ptr.hbm [resolvable:$true] %s13_s11 }
   0x2   :  { %8 = vsyncpa [#allocation5], 0  ;;  %s131_s12 = smov [#allocation2]   ;;  %s26_s16 = sshll.u32 %s165_s1, 4  ;;  %s27_s16 = int_to_ptr.hbm [resolvable:$true] %s26_s16 }
   0x3   :  { %s15_s13 = sshll.u32 %s131_s12, 4  ;;  %s132_s17 = smov 16   ;;  %s16_s13 = int_to_ptr.vmem [resolvable:$true] %s15_s13 }
   0x4   :  { %s133_s18 = smov 1   ;;  %s134_s19 = smov [#allocation4]  }
   0x5   :  { %21 = dma.hbm_to_vmem [thread:$0]  %s14_s11, 32, %s16_s13, [#allocation3], %s132_s17, %s132_s17, %s133_s18  }
   0x6   :  { %s28_s20 = sshll.u32 %s134_s19, 4  ;;  %s135_s21 = smov 128   ;;  %s29_s20 = int_to_ptr.vmem [resolvable:$true] %s28_s20 }
   0x7   :  { %s136_s22 = smov 8  }
   0x8   :  { %34 = dma.hbm_to_vmem [thread:$0]  %s27_s16, 256, %s29_s20, [#allocation5], %s135_s21, %s135_s21, %s136_s22  }
   0x9   :  { %127 = dma.done.wait [#allocation3], 32  }
   0xa   :  { %128 = vsyncadd [#allocation3], 4294967264 }
   0xb   :  { %129 = dma.done.wait [#allocation5], 256  }
   0xc   :  { %130 = vsyncadd [#allocation5], 4294967040  ;;  %v43_v0 = vld [vmem:[#allocation4] sm:$0xff]  ;;  %v77_v1 = vld [vmem:[#allocation2] ss:$0 sm:$0xff]  ;;  %vm55_vm0 = vcmask 130048  }
   0xd   :  { %v53_v2 = vmul.f32 %v77_v1, %v43_v0  ;;  %v78_v3 = vld [vmem:[#allocation2 + $0x1] ss:$0 sm:$0xff]  ;;  %v44_v4 = vld [vmem:[#allocation4 + $0x8] sm:$0xff]  ;;  %vm62_vm1 = vcmask 7168  }
   0xe   :  { %v54_v6 = vmul.f32 %v78_v3, %v44_v4 }
   0xf   :  { %v56_v5 = vsel %vm55_vm0, %v53_v2, 0.0 }
  0x10   :  { %57 = vadd.xlane.f32.xlu0 %v56_v5  ;;  %v59_v7 = vsel %vm55_vm0, %v54_v6, 0.0 }
  0x18   :  { %60 = vadd.xlane.f32.xlu0 %v59_v7 }
  0x83   :  { %v58_v8 = vpop.xlane.xlu0 %57 }
  0x84   :  { %63 = vst.msk [vmem:[%s166_s2] sm:$0xff] %vm62_vm1, %v58_v8 }
  0x8b   :  { %v61_v9 = vpop.xlane.xlu0 %60 }
  0x8c   :  { %64 = vst.msk [vmem:[%s166_s2 + $0x8] sm:$0xff] %vm62_vm1, %v61_v9 }
  0x8d   :  { %69 = vsyncpa [#allocation3], 1 }
  0x8e   :  { %70 = vsyncpa [#allocation5], 1 }

</bundles_post_ra>
